<compile_context>
chip_gen: v6e
topology: v6e:2x2x1
jax: 0.10.0
libtpu: 0.0.40
codegen_flags: <defaults>
</compile_context>

<pallas_src>
import jax
import jax.numpy as jnp
from jax.experimental import pallas as pl
from jax.experimental.pallas import tpu as pltpu

IN_F = 3
HID = 200
OUT_F = 1


def _policy_kernel(xt_ref, w1t_ref, b1c_ref, w2c_ref, b2_ref, o_ref):
    # xt_ref:  (3, TB)    batch in lanes
    # w1t_ref: (200, 3)   (== PyTorch fc1.weight layout)
    # b1c_ref: (200, 1)
    # w2c_ref: (200, 1)
    # b2_ref:  (1, 1)
    # o_ref:   (1, TB)
    xt = xt_ref[...]
    w1t = w1t_ref[...]

    # fc1 as VPU broadcast-FMA (K=3 is far too small for the MXU):
    # h[j, b] = sum_k w1t[j, k] * xt[k, b] + b1[j]
    h = b1c_ref[...]                       # (200, 1) -> broadcasts over lanes
    h = h + w1t[:, 0:1] * xt[0:1, :]
    h = h + w1t[:, 1:2] * xt[1:2, :]
    h = h + w1t[:, 2:3] * xt[2:3, :]

    # dropout(p=0.6) in eval mode -> identity
    h = jnp.maximum(h, 0.0)                # ReLU

    # fc3 (N=1): VPU multiply + sublane reduction instead of an MXU dot.
    y = jnp.sum(h * w2c_ref[...], axis=0, keepdims=True) + b2_ref[...]

    o_ref[...] = jax.nn.sigmoid(y).astype(o_ref.dtype)


def policy_net_forward(x, w1, b1, w2, b2, *, block_b=1024):
    """x: (B, 3) f32.  w1: (3, 200), b1: (1, 200) or (200,), w2: (200, 1), b2: (1, 1)."""
    B = x.shape[0]
    x = jnp.asarray(x, jnp.float32)

    # Batch-in-lanes layout; pick a lane-aligned batch tile and pad B to it.
    tb = max(128, min(block_b, pl.next_power_of_2(B)))
    Bp = pl.cdiv(B, tb) * tb

    xt = jnp.pad(x, ((0, Bp - B), (0, 0))).T                 # (3, Bp)
    w1t = jnp.asarray(w1, jnp.float32).T                     # (200, 3)
    b1c = jnp.asarray(b1, jnp.float32).reshape(HID, 1)       # (200, 1)
    w2c = jnp.asarray(w2, jnp.float32).reshape(HID, 1)       # (200, 1)
    b2s = jnp.asarray(b2, jnp.float32).reshape(1, 1)         # (1, 1)

    out_t = pl.pallas_call(
        _policy_kernel,
        out_shape=jax.ShapeDtypeStruct((1, Bp), jnp.float32),
        grid=(Bp // tb,),
        in_specs=[
            pl.BlockSpec((IN_F, tb), lambda i: (0, i)),      # x tile (streamed)
            pl.BlockSpec((HID, IN_F), lambda i: (0, 0)),     # w1 (resident)
            pl.BlockSpec((HID, 1), lambda i: (0, 0)),        # b1 (resident)
            pl.BlockSpec((HID, 1), lambda i: (0, 0)),        # w2 (resident)
            pl.BlockSpec((1, 1), lambda i: (0, 0)),          # b2 (resident)
        ],
        out_specs=pl.BlockSpec((1, tb), lambda i: (0, i)),   # lane-dense output
        compiler_params=pltpu.CompilerParams(
            dimension_semantics=("parallel",),               # megacore-shardable on v7x
        ),
    )(xt, w1t, b1c, w2c, b2s)

    return out_t[:, :B].reshape(B, OUT_F)


def init_params(key):
    """Deterministic PyTorch-style Linear init: U(-1/sqrt(fan_in), 1/sqrt(fan_in))."""
    k1, k2, k3, k4 = jax.random.split(key, 4)
    bound1 = 1.0 / jnp.sqrt(float(IN_F))
    bound2 = 1.0 / jnp.sqrt(float(HID))
    w1 = jax.random.uniform(k1, (IN_F, HID), jnp.float32, -bound1, bound1)
    b1 = jax.random.uniform(k2, (1, HID), jnp.float32, -bound1, bound1)
    w2 = jax.random.uniform(k3, (HID, OUT_F), jnp.float32, -bound2, bound2)
    b2 = jax.random.uniform(k4, (1, OUT_F), jnp.float32, -bound2, bound2)
    return w1, b1, w2, b2


def reference_forward(x, w1, b1, w2, b2):
    # HIGHEST precision so the f32 reference matches the exact-f32 VPU kernel.
    h = jnp.maximum(
        jnp.dot(x, w1, precision=jax.lax.Precision.HIGHEST) + b1, 0.0)
    return jax.nn.sigmoid(
        jnp.dot(h, w2, precision=jax.lax.Precision.HIGHEST) + b2)


if __name__ == "__main__":
    key = jax.random.PRNGKey(0)
    kx, kp = jax.random.split(key)
    w1, b1, w2, b2 = init_params(kp)

    # Pendulum-style observation: (cos theta, sin theta, theta_dot).
    B = 8
    x = jax.random.normal(kx, (B, IN_F), jnp.float32)
    out = jax.block_until_ready(policy_net_forward(x, w1, b1, w2, b2))
    ref = reference_forward(x, w1, b1, w2, b2)
    assert out.shape == (B, OUT_F)
    assert jnp.allclose(out, ref, atol=1e-5, rtol=1e-5)

    # Exercise the multi-tile (grid > 1) + padding path with a non-aligned batch.
    B2 = 200
    x2 = jax.random.normal(jax.random.PRNGKey(1), (B2, IN_F), jnp.float32)
    out2 = jax.block_until_ready(
        policy_net_forward(x2, w1, b1, w2, b2, block_b=128))
    ref2 = reference_forward(x2, w1, b1, w2, b2)
    assert out2.shape == (B2, OUT_F)
    assert jnp.allclose(out2, ref2, atol=1e-5, rtol=1e-5)

    print("KERNEL_OK")
</pallas_src>

<mosaic_0001>
module attributes {stable_mosaic.version = 11 : i64} {
  func.func @_policy_kernel(%arg0: i32, %arg1: memref<3x128xf32, #tpu.memory_space<vmem>>, %arg2: memref<200x3xf32, #tpu.memory_space<vmem>>, %arg3: memref<200x1xf32, #tpu.memory_space<vmem>>, %arg4: memref<200x1xf32, #tpu.memory_space<vmem>>, %arg5: memref<1x1xf32, #tpu.memory_space<vmem>>, %arg6: memref<1x128xf32, #tpu.memory_space<vmem>>) attributes {dimension_semantics = [#tpu.dimension_semantics<parallel>], iteration_bounds = array<i64: 1>, scalar_prefetch = 0 : i64, scratch_operands = 0 : i64, tpu.core_type = #tpu.core_type<tc>, window_params = [{transform_indices = @transform_0, window_bounds = array<i64: 3, 128>}, {pipeline_mode = #tpu.pipeline_mode<synchronous>, transform_indices = @transform_1, window_bounds = array<i64: 200, 3>}, {pipeline_mode = #tpu.pipeline_mode<synchronous>, transform_indices = @transform_2, window_bounds = array<i64: 200, 1>}, {pipeline_mode = #tpu.pipeline_mode<synchronous>, transform_indices = @transform_3, window_bounds = array<i64: 200, 1>}, {pipeline_mode = #tpu.pipeline_mode<synchronous>, transform_indices = @transform_4, window_bounds = array<i64: 1, 1>}, {transform_indices = @transform_5, window_bounds = array<i64: 1, 128>}]} {
    %c0 = arith.constant 0 : index
    %c0_0 = arith.constant 0 : index
    %0 = vector.load %arg1[%c0, %c0_0] : memref<3x128xf32, #tpu.memory_space<vmem>>, vector<3x128xf32>
    %c0_1 = arith.constant 0 : index
    %c0_2 = arith.constant 0 : index
    %1 = vector.load %arg2[%c0_1, %c0_2] : memref<200x3xf32, #tpu.memory_space<vmem>>, vector<200x3xf32>
    %c0_3 = arith.constant 0 : index
    %c0_4 = arith.constant 0 : index
    %2 = vector.load %arg3[%c0_3, %c0_4] : memref<200x1xf32, #tpu.memory_space<vmem>>, vector<200x1xf32>
    %3 = vector.extract_strided_slice %1 {offsets = [0, 0], sizes = [200, 1], strides = [1, 1]} : vector<200x3xf32> to vector<200x1xf32>
    %4 = vector.extract_strided_slice %0 {offsets = [0, 0], sizes = [1, 128], strides = [1, 1]} : vector<3x128xf32> to vector<1x128xf32>
    %5 = vector.broadcast %3 : vector<200x1xf32> to vector<200x128xf32>
    %6 = vector.broadcast %4 : vector<1x128xf32> to vector<200x128xf32>
    %7 = arith.mulf %5, %6 : vector<200x128xf32>
    %8 = vector.broadcast %2 : vector<200x1xf32> to vector<200x128xf32>
    %9 = arith.addf %8, %7 : vector<200x128xf32>
    %10 = vector.extract_strided_slice %1 {offsets = [0, 1], sizes = [200, 1], strides = [1, 1]} : vector<200x3xf32> to vector<200x1xf32>
    %11 = vector.extract_strided_slice %0 {offsets = [1, 0], sizes = [1, 128], strides = [1, 1]} : vector<3x128xf32> to vector<1x128xf32>
    %12 = vector.broadcast %10 : vector<200x1xf32> to vector<200x128xf32>
    %13 = vector.broadcast %11 : vector<1x128xf32> to vector<200x128xf32>
    %14 = arith.mulf %12, %13 : vector<200x128xf32>
    %15 = arith.addf %9, %14 : vector<200x128xf32>
    %16 = vector.extract_strided_slice %1 {offsets = [0, 2], sizes = [200, 1], strides = [1, 1]} : vector<200x3xf32> to vector<200x1xf32>
    %17 = vector.extract_strided_slice %0 {offsets = [2, 0], sizes = [1, 128], strides = [1, 1]} : vector<3x128xf32> to vector<1x128xf32>
    %18 = vector.broadcast %16 : vector<200x1xf32> to vector<200x128xf32>
    %19 = vector.broadcast %17 : vector<1x128xf32> to vector<200x128xf32>
    %20 = arith.mulf %18, %19 : vector<200x128xf32>
    %21 = arith.addf %15, %20 : vector<200x128xf32>
    %cst = arith.constant 0.000000e+00 : f32
    %22 = vector.broadcast %cst : f32 to vector<200x128xf32>
    %23 = arith.maximumf %21, %22 : vector<200x128xf32>
    %c0_5 = arith.constant 0 : index
    %c0_6 = arith.constant 0 : index
    %24 = vector.load %arg4[%c0_5, %c0_6] : memref<200x1xf32, #tpu.memory_space<vmem>>, vector<200x1xf32>
    %25 = vector.broadcast %24 : vector<200x1xf32> to vector<200x128xf32>
    %26 = arith.mulf %23, %25 : vector<200x128xf32>
    %cst_7 = arith.constant dense<0.000000e+00> : vector<128xf32>
    %27 = vector.multi_reduction <add>, %26, %cst_7 [0] : vector<200x128xf32> to vector<128xf32>
    %28 = vector.shape_cast %27 : vector<128xf32> to vector<1x128xf32>
    %c0_8 = arith.constant 0 : index
    %c0_9 = arith.constant 0 : index
    %29 = vector.load %arg5[%c0_8, %c0_9] : memref<1x1xf32, #tpu.memory_space<vmem>>, vector<1x1xf32>
    %30 = vector.broadcast %29 : vector<1x1xf32> to vector<1x128xf32>
    %31 = arith.addf %28, %30 : vector<1x128xf32>
    %32 = arith.negf %31 : vector<1x128xf32>
    %33 = math.exp %32 : vector<1x128xf32>
    %cst_10 = arith.constant 1.000000e+00 : f32
    %34 = vector.broadcast %cst_10 : f32 to vector<1x128xf32>
    %35 = arith.addf %34, %33 : vector<1x128xf32>
    %36 = arith.divf %34, %35 : vector<1x128xf32>
    %c0_11 = arith.constant 0 : index
    %c0_12 = arith.constant 0 : index
    %37 = vector.load %arg6[%c0_11, %c0_12] : memref<1x128xf32, #tpu.memory_space<vmem>>, vector<1x128xf32>
    tpu.vector_store %arg6[%c0_11, %c0_12], %36 {strides = array<i32>} : memref<1x128xf32, #tpu.memory_space<vmem>>, vector<1x128xf32>,
    return
  }
  func.func @transform_0(%arg0: i32) -> (i32, i32) {
    %c0_i32 = arith.constant 0 : i32
    %c0_i32_0 = arith.constant 0 : i32
    return %c0_i32, %arg0 : i32, i32
  }
  func.func @transform_1(%arg0: i32) -> (i32, i32) {
    %c0_i32 = arith.constant 0 : i32
    %c0_i32_0 = arith.constant 0 : i32
    %c0_i32_1 = arith.constant 0 : i32
    return %c0_i32, %c0_i32_0 : i32, i32
  }
  func.func @transform_2(%arg0: i32) -> (i32, i32) {
    %c0_i32 = arith.constant 0 : i32
    %c0_i32_0 = arith.constant 0 : i32
    %c0_i32_1 = arith.constant 0 : i32
    return %c0_i32, %c0_i32_0 : i32, i32
  }
  func.func @transform_3(%arg0: i32) -> (i32, i32) {
    %c0_i32 = arith.constant 0 : i32
    %c0_i32_0 = arith.constant 0 : i32
    %c0_i32_1 = arith.constant 0 : i32
    return %c0_i32, %c0_i32_0 : i32, i32
  }
  func.func @transform_4(%arg0: i32) -> (i32, i32) {
    %c0_i32 = arith.constant 0 : i32
    %c0_i32_0 = arith.constant 0 : i32
    %c0_i32_1 = arith.constant 0 : i32
    return %c0_i32, %c0_i32_0 : i32, i32
  }
  func.func @transform_5(%arg0: i32) -> (i32, i32) {
    %c0_i32 = arith.constant 0 : i32
    %c0_i32_0 = arith.constant 0 : i32
    return %c0_i32, %arg0 : i32, i32
  }
}

</mosaic_0001>

<bundles_post_ra>
// kernel: tpu_custom_call.1
= control target key start
LH: loop header
LB: loop body
LE: loop exit
PB: predicated region body
PF: predicated region fallthrough
CT: control target
= control target key end

     0   :  { %s1661_s0 = inlined_call_operand.vmem [shape: f32[3,128], index: 0, kind: input, shape index: {}]   ;;  %s1662_s1 = inlined_call_operand.vmem [shape: f32[200,3], index: 1, kind: input, shape index: {}]   ;;  %s1663_s2 = inlined_call_operand.vmem [shape: f32[200,1], index: 2, kind: input, shape index: {}]   ;;  %s1664_s3 = inlined_call_operand.vmem [shape: f32[200,1], index: 3, kind: input, shape index: {}]   ;;  %s1665_s4 = inlined_call_operand.<no memory space> [shape: f32[1,1], index: 4, kind: input, shape index: {}]   ;;  %s1666_s5 = inlined_call_operand.hbm [shape: f32[1,128], index: 5, kind: output, shape index: {}]  }
   0x1   :  { %v10_v0 = vstv %s1665_s4 }
   0x2   :  { %11 = vst [vmem:[#allocation2] sm:$0x1] %v10_v0 }
   0x3   :  { %v1028_v1 = vld [vmem:[%s1662_s1 + $0x10] sm:$0xff]  ;;  %v24_v2 = vld [vmem:[%s1662_s1] sm:$0xff]  ;;  %v988_v3 = vmov 1   ;;  %v1667_v4 = vmov 0   ;;  %v27_v5 = vld [vmem:[%s1662_s1 + $0x18] sm:$0xff] }
   0x4   :  { %954 = vset.pattern.permute.xlu0 %v988_v3  ;;  %953 = vset.pattern.permute.xlu1 %v1667_v4  ;;  %v29_v6 = vld [vmem:[%s1662_s1 + $0x28] sm:$0xff]  ;;  %v31_v7 = vld [vmem:[%s1662_s1 + $0x38] sm:$0xff] }
   0x5   :  { %86 = vperm.xlu1 %953, %v1028_v1   ;;  %379 = vperm.xlu0 %954, %v24_v2  }
   0x9   :  { %91 = vperm.xlu1 %953, %v27_v5   ;;  %391 = vperm.xlu0 %954, %v27_v5  }
   0xd   :  { %101 = vperm.xlu1 %953, %v29_v6   ;;  %399 = vperm.xlu0 %954, %v29_v6  }
  0x11   :  { %111 = vperm.xlu1 %953, %v31_v7   ;;  %407 = vperm.xlu0 %954, %v31_v7  }
  0x12   :  { %12 = vsyncpa [#allocation4], 0  ;;  %v33_v8 = vld [vmem:[%s1662_s1 + $0x48] sm:$0xff]  ;;  %v1051_v9 = vld [vmem:[%s1662_s1 + $0x58] sm:$0xff]  ;;  %v990_v17 = vmov 2  }
  0x13   :  { %v1058_v10 = vld [vmem:[%s1662_s1 + $0x68] sm:$0xff]  ;;  %v1065_v11 = vld [vmem:[%s1662_s1 + $0x78] sm:$0xff]  ;;  %v49_v16 = vld [vmem:[%s1663_s2] sm:$0xff] }
  0x14   :  { %v1072_v12 = vld [vmem:[%s1662_s1 + $0x88] sm:$0xff]  ;;  %v1079_v13 = vld [vmem:[%s1662_s1 + $0x98] sm:$0xff]  ;;  %v51_v18 = vld [vmem:[%s1663_s2 + $0x10] sm:$0xff] }
  0x15   :  { %121 = vperm.xlu1 %953, %v33_v8   ;;  %415 = vperm.xlu0 %954, %v33_v8   ;;  %v1086_v14 = vld [vmem:[%s1662_s1 + $0xa8] sm:$0xff]  ;;  %v1093_v15 = vld [vmem:[%s1662_s1 + $0xb8] sm:$0xff]  ;;  %v53_v19 = vld [vmem:[%s1663_s2 + $0x20] sm:$0xff] }
  0x16   :  { %v55_v20 = vld [vmem:[%s1663_s2 + $0x30] sm:$0xff]  ;;  %v57_v21 = vld [vmem:[%s1663_s2 + $0x40] sm:$0xff]  ;;  %v1123_v24 = vld [vmem:[%s1662_s1 + $0x8] sm:$0xff] }
  0x17   :  { %v59_v22 = vld [vmem:[%s1663_s2 + $0x50] sm:$0xff]  ;;  %v61_v23 = vld [vmem:[%s1663_s2 + $0x60] sm:$0xff]  ;;  %v50_v42 = vld [vmem:[%s1663_s2 + $0x8] sm:$0xff] }
  0x18   :  { %v63_v25 = vld [vmem:[%s1663_s2 + $0x70] sm:$0xff]  ;;  %v1132_v26 = vld [vmem:[%s1662_s1 + $0x20] sm:$0xff]  ;;  %v52_v45 = vld [vmem:[%s1663_s2 + $0x18] sm:$0xff] }
  0x19   :  { %131 = vperm.xlu1 %953, %v1051_v9   ;;  %423 = vperm.xlu0 %954, %v1051_v9   ;;  %v65_v27 = vld [vmem:[%s1663_s2 + $0x80] sm:$0xff]  ;;  %v1141_v28 = vld [vmem:[%s1662_s1 + $0x30] sm:$0xff]  ;;  %v54_v48 = vld [vmem:[%s1663_s2 + $0x28] sm:$0xff] }
  0x1a   :  { %v67_v29 = vld [vmem:[%s1663_s2 + $0x90] sm:$0xff]  ;;  %v1150_v30 = vld [vmem:[%s1662_s1 + $0x40] sm:$0xff]  ;;  %v56_v51 = vld [vmem:[%s1663_s2 + $0x38] sm:$0xff] }
  0x1b   :  { %v69_v31 = vld [vmem:[%s1663_s2 + $0xa0] sm:$0xff]  ;;  %v1159_v32 = vld [vmem:[%s1662_s1 + $0x50] sm:$0xff]  ;;  %v58_v54 = vld [vmem:[%s1663_s2 + $0x48] sm:$0xff] }
  0x1c   :  { %v71_v33 = vld [vmem:[%s1663_s2 + $0xb0] sm:$0xff]  ;;  %v1168_v34 = vld [vmem:[%s1662_s1 + $0x60] sm:$0xff]  ;;  %v60_v57 = vld [vmem:[%s1663_s2 + $0x58] sm:$0xff] }
  0x1d   :  { %141 = vperm.xlu1 %953, %v1058_v10   ;;  %431 = vperm.xlu0 %954, %v1058_v10   ;;  %v73_v35 = vld [vmem:[%s1663_s2 + $0xc0] sm:$0xff]  ;;  %v1177_v36 = vld [vmem:[%s1662_s1 + $0x70] sm:$0xff]  ;;  %v62_v60 = vld [vmem:[%s1663_s2 + $0x68] sm:$0xff] }
  0x1e   :  { %v1183_v37 = vld [vmem:[%s1662_s1 + $0x80] sm:$0xff]  ;;  %v1191_v38 = vld [vmem:[%s1662_s1 + $0x90] sm:$0xff]  ;;  %v64_v63 = vld [vmem:[%s1663_s2 + $0x78] sm:$0xff] }
  0x1f   :  { %v1198_v39 = vld [vmem:[%s1662_s1 + $0xa0] sm:$0xff]  ;;  %v1205_v40 = vld [vmem:[%s1662_s1 + $0xb0] sm:$0xff] }
  0x20   :  { %v1212_v41 = vld [vmem:[%s1662_s1 + $0xc0] sm:$0xff] }
  0x21   :  { %151 = vperm.xlu1 %953, %v1065_v11   ;;  %439 = vperm.xlu0 %954, %v1065_v11  }
  0x25   :  { %161 = vperm.xlu1 %953, %v1072_v12   ;;  %447 = vperm.xlu0 %954, %v1072_v12  }
  0x29   :  { %171 = vperm.xlu1 %953, %v1079_v13   ;;  %455 = vperm.xlu0 %954, %v1079_v13  }
  0x2d   :  { %181 = vperm.xlu1 %953, %v1086_v14   ;;  %463 = vperm.xlu0 %954, %v1086_v14  }
  0x31   :  { %191 = vperm.xlu1 %953, %v1093_v15   ;;  %471 = vperm.xlu0 %954, %v1093_v15  }
  0x35   :  { %230 = vperm.xlu1 %953, %v49_v16   ;;  %956 = vset.pattern.permute.xlu0 %v990_v17 }
  0x36   :  { %533 = vperm.xlu0 %956, %v24_v2  }
  0x39   :  { %240 = vperm.xlu1 %953, %v51_v18   ;;  %v70_v18 = vld [vmem:[%s1663_s2 + $0xa8] sm:$0xff] }
  0x3a   :  { %545 = vperm.xlu0 %956, %v27_v5  }
  0x3d   :  { %250 = vperm.xlu1 %953, %v53_v19  }
  0x3e   :  { %553 = vperm.xlu0 %956, %v29_v6  }
  0x41   :  { %260 = vperm.xlu1 %953, %v55_v20  }
  0x42   :  { %561 = vperm.xlu0 %956, %v31_v7   ;;  %v68_v7 = vld [vmem:[%s1663_s2 + $0x98] sm:$0xff] }
  0x45   :  { %270 = vperm.xlu1 %953, %v57_v21  }
  0x46   :  { %569 = vperm.xlu0 %956, %v33_v8  }
  0x49   :  { %280 = vperm.xlu1 %953, %v59_v22  }
  0x4a   :  { %958 = vset.pattern.permute.xlu0 %v1667_v4 }
  0x4b   :  { %76 = vperm.xlu0 %958, %v24_v2  }
  0x4d   :  { %290 = vperm.xlu1 %953, %v61_v23   ;;  %v711_v23 = vld [vmem:[%s1664_s3] sm:$0xff] }
  0x4f   :  { %81 = vperm.xlu0 %958, %v1123_v24  }
  0x51   :  { %300 = vperm.xlu1 %953, %v63_v25   ;;  %v714_v25 = vld [vmem:[%s1664_s3 + $0x18] sm:$0xff] }
  0x53   :  { %96 = vperm.xlu0 %958, %v1132_v26  }
  0x55   :  { %310 = vperm.xlu1 %953, %v65_v27  }
  0x57   :  { %106 = vperm.xlu0 %958, %v1141_v28  }
  0x59   :  { %320 = vperm.xlu1 %953, %v67_v29  }
  0x5b   :  { %116 = vperm.xlu0 %958, %v1150_v30  }
  0x5d   :  { %330 = vperm.xlu1 %953, %v69_v31  }
  0x5f   :  { %126 = vperm.xlu0 %958, %v1159_v32  }
  0x61   :  { %340 = vperm.xlu1 %953, %v71_v33  }
  0x63   :  { %136 = vperm.xlu0 %958, %v1168_v34  }
  0x65   :  { %350 = vperm.xlu1 %953, %v73_v35   ;;  %v713_v35 = vld [vmem:[%s1664_s3 + $0x10] sm:$0xff] }
  0x67   :  { %146 = vperm.xlu0 %958, %v1177_v36  }
  0x69   :  { %955 = vset.pattern.permute.xlu1 %v988_v3  ;;  %v66_v3 = vld [vmem:[%s1663_s2 + $0x88] sm:$0xff] }
  0x6a   :  { %383 = vperm.xlu1 %955, %v1123_v24  }
  0x6b   :  { %156 = vperm.xlu0 %958, %v1183_v37  }
  0x6e   :  { %387 = vperm.xlu1 %955, %v1028_v1  }
  0x6f   :  { %166 = vperm.xlu0 %958, %v1191_v38  }
  0x72   :  { %395 = vperm.xlu1 %955, %v1132_v26  }
  0x73   :  { %176 = vperm.xlu0 %958, %v1198_v39  }
  0x76   :  { %403 = vperm.xlu1 %955, %v1141_v28  }
  0x77   :  { %186 = vperm.xlu0 %958, %v1205_v40  }
  0x7a   :  { %411 = vperm.xlu1 %955, %v1150_v30  }
  0x7b   :  { %196 = vperm.xlu0 %958, %v1212_v41  }
  0x7e   :  { %419 = vperm.xlu1 %955, %v1159_v32  }
  0x7f   :  { %235 = vperm.xlu0 %958, %v50_v42  }
  0x80   :  { %v1220_v43 = vpop.permute.xlu1 %86  ;;  %v1222_v44 = vpop.permute.xlu0 %379 }
  0x82   :  { %427 = vperm.xlu1 %955, %v1168_v34  }
  0x83   :  { %245 = vperm.xlu0 %958, %v52_v45   ;;  %v719_v45 = vld [vmem:[%s1664_s3 + $0x40] sm:$0xff] }
  0x84   :  { %v1228_v46 = vpop.permute.xlu1 %91  ;;  %v1230_v47 = vpop.permute.xlu0 %391 }
  0x86   :  { %435 = vperm.xlu1 %955, %v1177_v36  }
  0x87   :  { %255 = vperm.xlu0 %958, %v54_v48  }
  0x88   :  { %v1236_v49 = vpop.permute.xlu1 %101  ;;  %v1238_v50 = vpop.permute.xlu0 %399 }
  0x8a   :  { %443 = vperm.xlu1 %955, %v1183_v37  }
  0x8b   :  { %265 = vperm.xlu0 %958, %v56_v51   ;;  %v715_v51 = vld [vmem:[%s1664_s3 + $0x20] sm:$0xff] }
  0x8c   :  { %v1244_v52 = vpop.permute.xlu1 %111  ;;  %v1246_v53 = vpop.permute.xlu0 %407 }
  0x8e   :  { %451 = vperm.xlu1 %955, %v1191_v38  }
  0x8f   :  { %275 = vperm.xlu0 %958, %v58_v54  }
  0x90   :  { %v1252_v55 = vpop.permute.xlu1 %121  ;;  %v1254_v56 = vpop.permute.xlu0 %415 }
  0x92   :  { %459 = vperm.xlu1 %955, %v1198_v39  }
  0x93   :  { %285 = vperm.xlu0 %958, %v60_v57   ;;  %v720_v57 = vld [vmem:[%s1664_s3 + $0x48] sm:$0xff] }
  0x94   :  { %v1260_v58 = vpop.permute.xlu1 %131  ;;  %v1262_v59 = vpop.permute.xlu0 %423 }
  0x96   :  { %467 = vperm.xlu1 %955, %v1205_v40  }
  0x97   :  { %295 = vperm.xlu0 %958, %v62_v60  }
  0x98   :  { %v1268_v61 = vpop.permute.xlu1 %141  ;;  %v1270_v62 = vpop.permute.xlu0 %431 }
  0x9a   :  { %475 = vperm.xlu1 %955, %v1212_v41  }
  0x9b   :  { %305 = vperm.xlu0 %958, %v64_v63   ;;  %v717_v63 = vld [vmem:[%s1664_s3 + $0x30] sm:$0xff] }
  0x9c   :  { %v1276_v0 = vpop.permute.xlu1 %151  ;;  %v1278_v2 = vpop.permute.xlu0 %439 }
  0x9e   :  { %957 = vset.pattern.permute.xlu1 %v990_v17 }
  0x9f   :  { %537 = vperm.xlu1 %957, %v1123_v24   ;;  %315 = vperm.xlu0 %958, %v66_v3  }
  0xa0   :  { %v1285_v5 = vpop.permute.xlu1 %161  ;;  %v1287_v6 = vpop.permute.xlu0 %447 }
  0xa3   :  { %541 = vperm.xlu1 %957, %v1028_v1   ;;  %325 = vperm.xlu0 %958, %v68_v7   ;;  %v72_v1 = vld [vmem:[%s1663_s2 + $0xb8] sm:$0xff]  ;;  %v721_v7 = vld [vmem:[%s1664_s3 + $0x50] sm:$0xff] }
  0xa4   :  { %v1293_v8 = vpop.permute.xlu1 %171  ;;  %v1295_v16 = vpop.permute.xlu0 %455 }
  0xa7   :  { %549 = vperm.xlu1 %957, %v1132_v26   ;;  %335 = vperm.xlu0 %958, %v70_v18   ;;  %v199_v18 = vlaneseq }
  0xa8   :  { %v1301_v19 = vpop.permute.xlu1 %181  ;;  %v1303_v20 = vpop.permute.xlu0 %463 }
  0xa9   :  { %1670 = vst [vmem:[#allocation6_spill] sm:$0xff] %v1303_v20 }
  0xab   :  { %557 = vperm.xlu1 %957, %v1141_v28   ;;  %345 = vperm.xlu0 %958, %v72_v1   ;;  %v716_v28 = vld [vmem:[%s1664_s3 + $0x28] sm:$0xff] }
  0xac   :  { %v1309_v21 = vpop.permute.xlu1 %191  ;;  %v1311_v22 = vpop.permute.xlu0 %471 }
  0xad   :  { %1671 = vst [vmem:[#allocation7_spill] sm:$0xff] %v1309_v21  ;;  %1672 = vst [vmem:[#allocation8_spill] sm:$0xff] %v1311_v22 }
  0xaf   :  { %565 = vperm.xlu1 %957, %v1150_v30   ;;  %738 = vperm.xlu0 %958, %v711_v23   ;;  %v712_v30 = vld [vmem:[%s1664_s3 + $0x8] sm:$0xff] }
  0xb0   :  { %v1317_v24 = vpop.permute.xlu1 %230 }
  0xb1   :  { %v1322_v26 = vpop.permute.xlu0 %533 }
  0xb3   :  { %573 = vperm.xlu1 %957, %v1159_v32   ;;  %753 = vperm.xlu0 %958, %v714_v25   ;;  %v718_v32 = vld [vmem:[%s1664_s3 + $0x38] sm:$0xff] }
  0xb4   :  { %v1325_v27 = vpop.permute.xlu1 %240  ;;  %v722_v25 = vld [vmem:[%s1664_s3 + $0x58] sm:$0xff] }
  0xb5   :  { %v1330_v29 = vpop.permute.xlu0 %545 }
  0xb7   :  { %959 = vset.pattern.permute.xlu1 %v1667_v4  ;;  %763 = vperm.xlu0 %958, %v716_v28   ;;  %v1371_v28 = vshrl.u32 %v199_v18, 7 }
  0xb8   :  { %v1336_v31 = vpop.permute.xlu1 %250  ;;  %743 = vperm.xlu1 %959, %v712_v30  }
  0xb9   :  { %v1341_v33 = vpop.permute.xlu0 %553  ;;  %1673 = vst [vmem:[#allocation9_spill] sm:$0xff] %v1371_v28 }
  0xbb   :  { %773 = vperm.xlu0 %958, %v718_v32  }
  0xbc   :  { %v261_v42 = vpop.permute.xlu1 %260  ;;  %748 = vperm.xlu1 %959, %v713_v35   ;;  %v723_v35 = vld [vmem:[%s1664_s3 + $0x60] sm:$0xff] }
  0xbd   :  { %v1349_v48 = vpop.permute.xlu0 %561 }
  0xbf   :  { %778 = vperm.xlu0 %958, %v719_v45   ;;  %v1668_v45 = vsub.s32 0, %v1371_v28 }
  0xc0   :  { %v271_v54 = vpop.permute.xlu1 %270  ;;  %758 = vperm.xlu1 %959, %v715_v51  }
  0xc1   :  { %v1357_v60 = vpop.permute.xlu0 %569 }
  0xc3   :  { %783 = vperm.xlu0 %958, %v720_v57   ;;  %v724_v57 = vld [vmem:[%s1664_s3 + $0x68] sm:$0xff] }
  0xc4   :  { %v281_v3 = vpop.permute.xlu1 %280  ;;  %768 = vperm.xlu1 %959, %v717_v63  }
  0xc6   :  { %v1365_v1 = vpop.permute.xlu0 %76 }
  0xc7   :  { %788 = vperm.xlu0 %958, %v721_v7  }
  0xc8   :  { %v291_v23 = vpop.permute.xlu1 %290  ;;  %960 = vset.pattern.permute.xlu1 %v990_v17  ;;  %v1384_v17 = vld [vmem:[%s1661_s0] sm:$0x7] }
  0xc9   :  { %577 = vperm.xlu1 %960, %v1051_v9   ;;  %v1392_v63 = vrot.slane %v1384_v17, %v1668_v45 }
  0xca   :  { %v1374_v30 = vpop.permute.xlu0 %81 }
  0xcb   :  { %793 = vperm.xlu0 %958, %v722_v25   ;;  %v725_v25 = vld [vmem:[%s1664_s3 + $0x70] sm:$0xff] }
  0xcc   :  { %v301_v32 = vpop.permute.xlu1 %300 }
  0xcd   :  { %581 = vperm.xlu1 %960, %v1168_v34  }
  0xce   :  { %v97_v51 = vpop.permute.xlu0 %96 }
  0xcf   :  { %798 = vperm.xlu0 %958, %v723_v35  }
  0xd0   :  { %v311_v9 = vpop.permute.xlu1 %310 }
  0xd1   :  { %585 = vperm.xlu1 %960, %v1058_v10   ;;  %v726_v10 = vld [vmem:[%s1664_s3 + $0x78] sm:$0xff] }
  0xd2   :  { %v107_v34 = vpop.permute.xlu0 %106 }
  0xd3   :  { %v209_v7 = vmul.f32 %v1392_v63, %v107_v34  ;;  %803 = vperm.xlu0 %958, %v724_v57  }
  0xd4   :  { %v321_v18 = vpop.permute.xlu1 %320 }
  0xd5   :  { %v359_v35 = vadd.f32 %v261_v42, %v209_v7  ;;  %589 = vperm.xlu1 %960, %v1177_v36   ;;  %v727_v36 = vld [vmem:[%s1664_s3 + $0x80] sm:$0xff] }
  0xd6   :  { %v117_v4 = vpop.permute.xlu0 %116 }
  0xd7   :  { %v211_v22 = vmul.f32 %v1392_v63, %v117_v4  ;;  %808 = vperm.xlu0 %958, %v725_v25  }
  0xd8   :  { %v331_v45 = vpop.permute.xlu1 %330 }
  0xd9   :  { %v1404_v21 = vadd.f32 %v271_v54, %v211_v22  ;;  %593 = vperm.xlu1 %960, %v1065_v11   ;;  %v728_v11 = vld [vmem:[%s1664_s3 + $0x88] sm:$0xff] }
  0xda   :  { %v127_v57 = vpop.permute.xlu0 %126 }
  0xdb   :  { %v213_v34 = vmul.f32 %v1392_v63, %v127_v57  ;;  %813 = vperm.xlu0 %958, %v726_v10  }
  0xdc   :  { %v341_v42 = vpop.permute.xlu1 %340 }
  0xdd   :  { %v1411_v4 = vadd.f32 %v281_v3, %v213_v34  ;;  %597 = vperm.xlu1 %960, %v1183_v37   ;;  %v729_v37 = vld [vmem:[%s1664_s3 + $0x90] sm:$0xff] }
  0xde   :  { %v137_v7 = vpop.permute.xlu0 %136 }
  0xdf   :  { %v215_v25 = vmul.f32 %v1392_v63, %v137_v7  ;;  %818 = vperm.xlu0 %958, %v727_v36  }
  0xe0   :  { %v351_v22 = vpop.permute.xlu1 %350 }
  0xe1   :  { %v1418_v54 = vadd.f32 %v291_v23, %v215_v25  ;;  %601 = vperm.xlu1 %960, %v1072_v12   ;;  %v480_v23 = vsub.s32 1, %v1371_v28  ;;  %v730_v12 = vld [vmem:[%s1664_s3 + $0x98] sm:$0xff] }
  0xe2   :  { %v147_v10 = vpop.permute.xlu0 %146 }
  0xe3   :  { %v217_v57 = vmul.f32 %v1392_v63, %v147_v10  ;;  %823 = vperm.xlu0 %958, %v728_v11  }
  0xe5   :  { %v1425_v3 = vadd.f32 %v301_v32, %v217_v57  ;;  %605 = vperm.xlu1 %960, %v1191_v38   ;;  %v384_v34 = vpop.permute.xlu1 %383  ;;  %v207_v32 = vmul.f32 %v1392_v63, %v97_v51  ;;  %v1441_v57 = vrot.slane %v1384_v17, %v480_v23  ;;  %v732_v23 = vld [vmem:[%s1664_s3 + $0xa8] sm:$0xff] }
  0xe6   :  { %v157_v36 = vpop.permute.xlu0 %156 }
  0xe7   :  { %v219_v7 = vmul.f32 %v1392_v63, %v157_v36  ;;  %828 = vperm.xlu0 %958, %v729_v37   ;;  %v731_v37 = vld [vmem:[%s1664_s3 + $0xa0] sm:$0xff] }
  0xe9   :  { %v1433_v25 = vadd.f32 %v311_v9, %v219_v7  ;;  %609 = vperm.xlu1 %960, %v1079_v13   ;;  %v1436_v11 = vpop.permute.xlu1 %387  ;;  %v357_v9 = vadd.f32 %v1336_v31, %v207_v32 }
  0xea   :  { %v167_v38 = vpop.permute.xlu0 %166 }
  0xeb   :  { %v221_v10 = vmul.f32 %v1392_v63, %v167_v38  ;;  %833 = vperm.xlu0 %958, %v730_v12  }
  0xed   :  { %v1446_v36 = vadd.f32 %v321_v18, %v221_v10  ;;  %613 = vperm.xlu1 %960, %v1198_v39   ;;  %v396_v13 = vpop.permute.xlu1 %395 }
  0xee   :  { %v486_v51 = vmul.f32 %v1441_v57, %v396_v13  ;;  %v177_v7 = vpop.permute.xlu0 %176 }
  0xef   :  { %v223_v38 = vmul.f32 %v1392_v63, %v177_v7  ;;  %838 = vperm.xlu0 %958, %v731_v37   ;;  %v734_v37 = vld [vmem:[%s1664_s3 + $0xb8] sm:$0xff] }
  0xf0   :  { %v1452_v12 = vadd.f32 %v486_v51, %v357_v9 }
  0xf1   :  { %v1457_v20 = vadd.f32 %v331_v45, %v223_v38  ;;  %617 = vperm.xlu1 %960, %v1086_v14   ;;  %v404_v39 = vpop.permute.xlu1 %403  ;;  %v634_v38 = vsub.s32 2, %v1371_v28 }
  0xf2   :  { %v488_v18 = vmul.f32 %v1441_v57, %v404_v39  ;;  %v187_v31 = vpop.permute.xlu0 %186 }
  0xf3   :  { %v225_v32 = vmul.f32 %v1392_v63, %v187_v31  ;;  %843 = vperm.xlu0 %958, %v732_v23   ;;  %v204_v23 = vmul.f32 %v1392_v63, %v1374_v30  ;;  %v483_v31 = vmul.f32 %v1441_v57, %v384_v34  ;;  %v1489_v30 = vrot.slane %v1384_v17, %v634_v38 }
  0xf4   :  { %v1462_v10 = vadd.f32 %v488_v18, %v359_v35  ;;  %v916_v35 = vld [vmem:[#allocation2] sm:$0x1]  ;;  %v485_v34 = vmul.f32 %v1441_v57, %v1230_v47  ;;  %v208_v17 = vmul.f32 %v1392_v63, %v1236_v49 }
  0xf5   :  { %v1467_v13 = vadd.f32 %v341_v42, %v225_v32  ;;  %621 = vperm.xlu1 %960, %v1205_v40   ;;  %v412_v45 = vpop.permute.xlu1 %411 }
  0xf6   :  { %v490_v14 = vmul.f32 %v1441_v57, %v412_v45  ;;  %v197_v9 = vpop.permute.xlu0 %196 }
  0xf7   :  { %v227_v51 = vmul.f32 %v1392_v63, %v197_v9  ;;  %853 = vperm.xlu0 %958, %v734_v37   ;;  %v206_v37 = vmul.f32 %v1392_v63, %v1228_v46 }
  0xf8   :  { %v1473_v7 = vadd.f32 %v490_v14, %v1404_v21 }
  0xf9   :  { %v1478_v42 = vadd.f32 %v351_v22, %v227_v51  ;;  %625 = vperm.xlu1 %960, %v1093_v15   ;;  %v420_v40 = vpop.permute.xlu1 %419 }
  0xfa   :  { %v492_v39 = vmul.f32 %v1441_v57, %v420_v40  ;;  %v236_v18 = vpop.permute.xlu0 %235  ;;  %v487_v40 = vmul.f32 %v1441_v57, %v1238_v50 }
  0xfb   :  { %v354_v32 = vadd.f32 %v236_v18, %v204_v23  ;;  %919 = vperm.xlu0 %958, %v916_v35   ;;  %v1674_v35 = vmov 0   ;;  %v210_v18 = vmul.f32 %v1392_v63, %v1244_v52  ;;  %v212_v52 = vmul.f32 %v1392_v63, %v1252_v55 }
  0xfc   :  { %v1484_v21 = vadd.f32 %v492_v39, %v1411_v4  ;;  %v733_v4 = vld [vmem:[%s1664_s3 + $0xb0] sm:$0xff]  ;;  %v645_v55 = vmul.f32 %v1489_v30, %v1357_v60 }
  0xfd   :  { %v1491_v22 = vadd.f32 %v483_v31, %v354_v32  ;;  %629 = vperm.xlu1 %960, %v1212_v41   ;;  %v428_v15 = vpop.permute.xlu1 %427  ;;  %v639_v41 = vmul.f32 %v1489_v30, %v1330_v29  ;;  %v641_v31 = vmul.f32 %v1489_v30, %v1341_v33  ;;  %v643_v33 = vmul.f32 %v1489_v30, %v1349_v48 }
  0xfe   :  { %v494_v45 = vmul.f32 %v1441_v57, %v428_v15  ;;  %v246_v14 = vpop.permute.xlu0 %245 }
  0xff   :  { %v356_v9 = vadd.f32 %v246_v14, %v206_v37 }
 0x100   :  { %v1501_v46 = vadd.f32 %v494_v45, %v1418_v54  ;;  %v735_v54 = vld [vmem:[%s1664_s3 + $0xc0] sm:$0xff]  ;;  %v489_v45 = vmul.f32 %v1441_v57, %v1246_v53  ;;  %v491_v53 = vmul.f32 %v1441_v57, %v1254_v56  ;;  %s991_s3 = smov [#allocation3]  }
 0x101   :  { %v510_v51 = vadd.f32 %v485_v34, %v356_v9  ;;  %961 = vset.pattern.permute.xlu1 %v1674_v35  ;;  %v436_v38 = vpop.permute.xlu1 %435  ;;  %s940_s10 = sshll.u32 %s991_s3, 4  ;;  %s941_s10 = int_to_ptr.vmem [resolvable:$true] %s940_s10 }
 0x102   :  { %v496_v47 = vmul.f32 %v1441_v57, %v436_v38  ;;  %848 = vperm.xlu1 %961, %v733_v4   ;;  %v256_v23 = vpop.permute.xlu0 %255  ;;  %s966_s11 = scalar_lea.vmem %s941_s10, 16  ;;  %s970_s12 = scalar_lea.vmem %s941_s10, 32 }
 0x103   :  { %v358_v39 = vadd.f32 %v256_v23, %v208_v17  ;;  %v1514_v49 = vadd.f32 %v639_v41, %v510_v51  ;;  %p967_p0 = scmp.ne.s32.totalorder %s941_s10, %s966_s11  ;;  %p971_p1 = scmp.lt.s32.totalorder %s941_s10, %s941_s10 }
 0x104   :  { %v1517_v29 = vadd.f32 %v496_v47, %v1425_v3  ;;  %p972_p2 = scmp.lt.s32.totalorder %s970_s12, %s966_s11 }
 0x105   :  { %v512_v32 = vadd.f32 %v487_v40, %v358_v39  ;;  %v444_v37 = vpop.permute.xlu1 %443 }
 0x106   :  { %v498_v50 = vmul.f32 %v1441_v57, %v444_v37  ;;  %858 = vperm.xlu1 %961, %v735_v54   ;;  %v266_v15 = vpop.permute.xlu0 %265  ;;  %p973_p3 = por %p972_p2, %p971_p1 }
 0x107   :  { %v360_v14 = vadd.f32 %v266_v15, %v210_v18  ;;  %v1526_v34 = vadd.f32 %v641_v31, %v512_v32 }
 0x108   :  { %v1529_v3 = vadd.f32 %v498_v50, %v1433_v25  ;;  %p974_p4 = pnand %p973_p3, %p967_p0 }
 0x109   :  { %v514_v9 = vadd.f32 %v489_v45, %v360_v14  ;;  %v452_v4 = vpop.permute.xlu1 %451  ;;  %v203_v14 = vmul.f32 %v1392_v63, %v1365_v1  ;;  %v636_v1 = vmul.f32 %v1489_v30, %v1322_v26 }
 0x10a   :  { %v500_v17 = vmul.f32 %v1441_v57, %v452_v4  ;;  %v276_v41 = vpop.permute.xlu0 %275 }
 0x10b   :  { %v362_v51 = vadd.f32 %v276_v41, %v212_v52  ;;  %v1538_v35 = vadd.f32 %v643_v33, %v514_v9  ;;  %v353_v33 = vadd.f32 %v1317_v24, %v203_v14  ;;  %v484_v24 = vmul.f32 %v1441_v57, %v1436_v11 }
 0x10c   :  { %v1541_v25 = vadd.f32 %v500_v17, %v1446_v36 }
 0x10d   :  { %v516_v38 = vadd.f32 %v491_v53, %v362_v51  ;;  %v460_v47 = vpop.permute.xlu1 %459 }
 0x10e   :  { %v502_v48 = vmul.f32 %v1441_v57, %v460_v47  ;;  %v1546_v23 = vpop.permute.xlu0 %285 }
 0x10f   :  { %v1548_v40 = vadd.f32 %v645_v55, %v516_v38  ;;  %v205_v55 = vmul.f32 %v1392_v63, %v1220_v43 }
 0x110   :  { %v1551_v39 = vadd.f32 %v502_v48, %v1457_v20 }
 0x111   :  { %v468_v56 = vpop.permute.xlu1 %467  ;;  %v355_v38 = vadd.f32 %v1325_v27, %v205_v55  ;;  %v689_v55 = vmax.f32 %v1514_v49, 0.0 }
 0x112   :  { %v504_v54 = vmul.f32 %v1441_v57, %v468_v56  ;;  %v1554_v18 = vpop.permute.xlu0 %295 }
 0x114   :  { %v1557_v36 = vadd.f32 %v504_v54, %v1467_v13 }
 0x115   :  { %v476_v60 = vpop.permute.xlu1 %475 }
 0x116   :  { %v506_v31 = vmul.f32 %v1441_v57, %v476_v60  ;;  %v1560_v32 = vpop.permute.xlu0 %305  ;;  %v509_v60 = vadd.f32 %v484_v24, %v355_v38 }
 0x118   :  { %v1563_v37 = vadd.f32 %v506_v31, %v1478_v42  ;;  %v482_v42 = vmul.f32 %v1441_v57, %v1222_v44 }
 0x11a   :  { %v538_v50 = vpop.permute.xlu1 %537  ;;  %v1565_v15 = vpop.permute.xlu0 %315  ;;  %v507_v17 = vadd.f32 %v482_v42, %v353_v33 }
 0x11b   :  { %v637_v41 = vmul.f32 %v1489_v30, %v538_v50 }
 0x11c   :  { %v661_v48 = vadd.f32 %v636_v1, %v507_v17 }
 0x11d   :  { %v662_v47 = vadd.f32 %v637_v41, %v1491_v22 }
 0x11e   :  { %v542_v20 = vpop.permute.xlu1 %541  ;;  %v1567_v45 = vpop.permute.xlu0 %325  ;;  %v686_v43 = vmax.f32 %v661_v48, 0.0 }
 0x11f   :  { %v638_v44 = vmul.f32 %v1489_v30, %v542_v20  ;;  %v687_v33 = vmax.f32 %v662_v47, 0.0 }
 0x121   :  { %v663_v31 = vadd.f32 %v638_v44, %v509_v60 }
 0x122   :  { %v550_v52 = vpop.permute.xlu1 %549  ;;  %v1571_v13 = vpop.permute.xlu0 %335 }
 0x123   :  { %v640_v50 = vmul.f32 %v1489_v30, %v550_v52  ;;  %v688_v20 = vmax.f32 %v663_v31, 0.0 }
 0x125   :  { %v665_v27 = vadd.f32 %v640_v50, %v1452_v12 }
 0x126   :  { %v558_v9 = vpop.permute.xlu1 %557  ;;  %v1574_v4 = vpop.permute.xlu0 %345 }
 0x127   :  { %v642_v11 = vmul.f32 %v1489_v30, %v558_v9  ;;  %v691_v9 = vmax.f32 %v1526_v34, 0.0 }
 0x129   :  { %v667_v24 = vadd.f32 %v642_v11, %v1462_v10  ;;  %v214_v10 = vmul.f32 %v1392_v63, %v1260_v58 }
 0x12a   :  { %v566_v53 = vpop.permute.xlu1 %565  ;;  %v739_v51 = vpop.permute.xlu0 %738 }
 0x12b   :  { %v861_v42 = vmul.f32 %v739_v51, %v686_v43  ;;  %v644_v52 = vmul.f32 %v1489_v30, %v566_v53  ;;  %v690_v51 = vmax.f32 %v665_v27, 0.0  ;;  %v364_v34 = vadd.f32 %v1546_v23, %v214_v10 }
 0x12d   :  { %v669_v31 = vadd.f32 %v644_v52, %v1473_v7 }
 0x12e   :  { %v574_v56 = vpop.permute.xlu1 %573  ;;  %v754_v54 = vpop.permute.xlu0 %753 }
 0x12f   :  { %v864_v38 = vmul.f32 %v754_v54, %v689_v55  ;;  %v646_v50 = vmul.f32 %v1489_v30, %v574_v56  ;;  %v693_v54 = vmax.f32 %v1538_v35, 0.0  ;;  %v493_v56 = vmul.f32 %v1441_v57, %v1262_v59 }
 0x131   :  { %v671_v11 = vadd.f32 %v646_v50, %v1484_v21  ;;  %v216_v21 = vmul.f32 %v1392_v63, %v1268_v61 }
 0x132   :  { %v764_v14 = vpop.permute.xlu0 %763 }
 0x133   :  { %v744_v26 = vpop.permute.xlu1 %743  ;;  %v866_v49 = vmul.f32 %v764_v14, %v691_v9  ;;  %v696_v52 = vmax.f32 %v671_v11, 0.0  ;;  %v366_v59 = vadd.f32 %v1554_v18, %v216_v21  ;;  %v218_v18 = vmul.f32 %v1392_v63, %v1276_v0 }
 0x134   :  { %v862_v28 = vmul.f32 %v744_v26, %v687_v33 }
 0x136   :  { %v886_v22 = vadd.f32 %v862_v28, %v861_v42  ;;  %v774_v41 = vpop.permute.xlu0 %773  ;;  %v692_v28 = vmax.f32 %v667_v24, 0.0 }
 0x137   :  { %v749_v17 = vpop.permute.xlu1 %748  ;;  %v868_v27 = vmul.f32 %v774_v41, %v693_v54 }
 0x138   :  { %v863_v1 = vmul.f32 %v749_v17, %v688_v20  ;;  %v695_v17 = vmax.f32 %v1548_v40, 0.0 }
 0x13a   :  { %v887_v47 = vadd.f32 %v886_v22, %v863_v1  ;;  %v779_v44 = vpop.permute.xlu0 %778  ;;  %v694_v22 = vmax.f32 %v669_v31, 0.0  ;;  %v518_v1 = vadd.f32 %v493_v56, %v364_v34 }
 0x13b   :  { %v759_v48 = vpop.permute.xlu1 %758 }
 0x13c   :  { %v865_v60 = vmul.f32 %v759_v48, %v690_v51  ;;  %v888_v12 = vadd.f32 %v887_v47, %v864_v38  ;;  %v869_v14 = vmul.f32 %v779_v44, %v694_v22 }
 0x13e   :  { %v889_v43 = vadd.f32 %v888_v12, %v865_v60  ;;  %v784_v33 = vpop.permute.xlu0 %783  ;;  %v495_v12 = vmul.f32 %v1441_v57, %v1270_v62 }
 0x13f   :  { %v769_v53 = vpop.permute.xlu1 %768  ;;  %v870_v24 = vmul.f32 %v784_v33, %v695_v17 }
 0x140   :  { %v867_v26 = vmul.f32 %v769_v53, %v692_v28  ;;  %v890_v42 = vadd.f32 %v889_v43, %v866_v49  ;;  %v520_v49 = vadd.f32 %v495_v12, %v366_v59 }
 0x142   :  { %v891_v7 = vadd.f32 %v890_v42, %v867_v26  ;;  %v789_v20 = vpop.permute.xlu0 %788  ;;  %v368_v42 = vadd.f32 %v1560_v32, %v218_v18  ;;  %v220_v32 = vmul.f32 %v1392_v63, %v1285_v5 }
 0x143   :  { %v871_v47 = vmul.f32 %v789_v20, %v696_v52 }
 0x144   :  { %v892_v58 = vadd.f32 %v891_v7, %v868_v27  ;;  %v578_v55 = vpop.permute.xlu1 %577  ;;  %v497_v27 = vmul.f32 %v1441_v57, %v1278_v2 }
 0x145   :  { %v647_v35 = vmul.f32 %v1489_v30, %v578_v55 }
 0x146   :  { %v893_v23 = vadd.f32 %v892_v58, %v869_v14  ;;  %v794_v38 = vpop.permute.xlu0 %793  ;;  %v522_v56 = vadd.f32 %v497_v27, %v368_v42 }
 0x147   :  { %v672_v41 = vadd.f32 %v647_v35, %v518_v1 }
 0x148   :  { %v894_v51 = vadd.f32 %v893_v23, %v870_v24  ;;  %v582_v48 = vpop.permute.xlu1 %581  ;;  %v370_v24 = vadd.f32 %v1565_v15, %v220_v32  ;;  %v222_v15 = vmul.f32 %v1392_v63, %v1293_v8 }
 0x149   :  { %v697_v44 = vmax.f32 %v672_v41, 0.0  ;;  %v648_v40 = vmul.f32 %v1489_v30, %v582_v48 }
 0x14a   :  { %v895_v9 = vadd.f32 %v894_v51, %v871_v47  ;;  %v799_v60 = vpop.permute.xlu0 %798  ;;  %v372_v12 = vadd.f32 %v1567_v45, %v222_v15  ;;  %v224_v45 = vmul.f32 %v1392_v63, %v1301_v19 }
 0x14b   :  { %v872_v28 = vmul.f32 %v794_v38, %v697_v44  ;;  %v673_v31 = vadd.f32 %v648_v40, %v1501_v46  ;;  %v499_v38 = vmul.f32 %v1441_v57, %v1287_v6 }
 0x14c   :  { %v586_v50 = vpop.permute.xlu1 %585 }
 0x14d   :  { %v896_v61 = vadd.f32 %v895_v9, %v872_v28  ;;  %v698_v43 = vmax.f32 %v673_v31, 0.0  ;;  %v649_v33 = vmul.f32 %v1489_v30, %v586_v50  ;;  %v524_v51 = vadd.f32 %v499_v38, %v370_v24 }
 0x14e   :  { %v804_v10 = vpop.permute.xlu0 %803  ;;  %v501_v50 = vmul.f32 %v1441_v57, %v1295_v16 }
 0x14f   :  { %v873_v53 = vmul.f32 %v799_v60, %v698_v43  ;;  %v674_v54 = vadd.f32 %v649_v33, %v520_v49 }
 0x150   :  { %v590_v26 = vpop.permute.xlu1 %589  ;;  %v526_v33 = vadd.f32 %v501_v50, %v372_v12 }
 0x151   :  { %v897_v34 = vadd.f32 %v896_v61, %v873_v53  ;;  %v699_v62 = vmax.f32 %v674_v54, 0.0  ;;  %v650_v11 = vmul.f32 %v1489_v30, %v590_v26 }
 0x152   :  { %v809_v46 = vpop.permute.xlu0 %808 }
 0x153   :  { %v874_v22 = vmul.f32 %v804_v10, %v699_v62  ;;  %v675_v7 = vadd.f32 %v650_v11, %v1517_v29 }
 0x154   :  { %v594_v20 = vpop.permute.xlu1 %593 }
 0x155   :  { %v898_v14 = vadd.f32 %v897_v34, %v874_v22  ;;  %v700_v0 = vmax.f32 %v675_v7, 0.0  ;;  %v651_v17 = vmul.f32 %v1489_v30, %v594_v20  ;;  %v374_v34 = vadd.f32 %v1571_v13, %v224_v45  ;;  %v1676_v13 = vld [vmem:[#allocation7_spill] sm:$0xff] }
 0x156   :  { %v814_v58 = vpop.permute.xlu0 %813  ;;  %v226_v32 = vmul.f32 %v1392_v63, %v1676_v13 }
 0x157   :  { %v875_v55 = vmul.f32 %v809_v46, %v700_v0  ;;  %v676_v1 = vadd.f32 %v651_v17, %v522_v56 }
 0x158   :  { %v598_v35 = vpop.permute.xlu1 %597  ;;  %v376_v24 = vadd.f32 %v1574_v4, %v226_v32 }
 0x159   :  { %v899_v52 = vadd.f32 %v898_v14, %v875_v55  ;;  %v701_v2 = vmax.f32 %v676_v1, 0.0  ;;  %v652_v23 = vmul.f32 %v1489_v30, %v598_v35 }
 0x15a   :  { %v819_v29 = vpop.permute.xlu0 %818 }
 0x15b   :  { %v876_v21 = vmul.f32 %v814_v58, %v701_v2  ;;  %v677_v41 = vadd.f32 %v652_v23, %v1529_v3 }
 0x15c   :  { %v602_v47 = vpop.permute.xlu1 %601 }
 0x15d   :  { %v900_v48 = vadd.f32 %v899_v52, %v876_v21  ;;  %v702_v5 = vmax.f32 %v677_v41, 0.0  ;;  %v653_v59 = vmul.f32 %v1489_v30, %v602_v47 }
 0x15e   :  { %v824_v44 = vpop.permute.xlu0 %823 }
 0x15f   :  { %v877_v40 = vmul.f32 %v819_v29, %v702_v5  ;;  %v678_v9 = vadd.f32 %v653_v59, %v524_v51 }
 0x160   :  { %v606_v60 = vpop.permute.xlu1 %605 }
 0x161   :  { %v901_v28 = vadd.f32 %v900_v48, %v877_v40  ;;  %v703_v6 = vmax.f32 %v678_v9, 0.0  ;;  %v654_v31 = vmul.f32 %v1489_v30, %v606_v60 }
 0x162   :  { %v829_v3 = vpop.permute.xlu0 %828 }
 0x163   :  { %v878_v49 = vmul.f32 %v824_v44, %v703_v6  ;;  %v679_v61 = vadd.f32 %v654_v31, %v1541_v25  ;;  %v1675_v25 = vld [vmem:[#allocation6_spill] sm:$0xff] }
 0x164   :  { %v610_v43 = vpop.permute.xlu1 %609  ;;  %v503_v46 = vmul.f32 %v1441_v57, %v1675_v25 }
 0x165   :  { %v902_v10 = vadd.f32 %v901_v28, %v878_v49  ;;  %v704_v8 = vmax.f32 %v679_v61, 0.0  ;;  %v655_v18 = vmul.f32 %v1489_v30, %v610_v43 }
 0x166   :  { %v834_v53 = vpop.permute.xlu0 %833  ;;  %v528_v56 = vadd.f32 %v503_v46, %v374_v34 }
 0x167   :  { %v879_v54 = vmul.f32 %v829_v3, %v704_v8  ;;  %v680_v26 = vadd.f32 %v655_v18, %v526_v33  ;;  %v1678_v33 = vld [vmem:[#allocation9_spill] sm:$0xff] }
 0x168   :  { %v614_v42 = vpop.permute.xlu1 %613 }
 0x169   :  { %v903_v62 = vadd.f32 %v902_v10, %v879_v54  ;;  %v705_v16 = vmax.f32 %v680_v26, 0.0  ;;  %v656_v11 = vmul.f32 %v1489_v30, %v614_v42  ;;  %v1679_v10 = vsub.s32 0, %v1678_v33 }
 0x16a   :  { %v839_v7 = vpop.permute.xlu0 %838 }
 0x16b   :  { %v880_v27 = vmul.f32 %v834_v53, %v705_v16  ;;  %v681_v22 = vadd.f32 %v656_v11, %v1551_v39  ;;  %v1677_v39 = vld [vmem:[#allocation8_spill] sm:$0xff] }
 0x16c   :  { %v618_v20 = vpop.permute.xlu1 %617  ;;  %v505_v23 = vmul.f32 %v1441_v57, %v1677_v39 }
 0x16d   :  { %v904_v14 = vadd.f32 %v903_v62, %v880_v27  ;;  %v706_v19 = vmax.f32 %v681_v22, 0.0  ;;  %v657_v0 = vmul.f32 %v1489_v30, %v618_v20 }
 0x16e   :  { %v844_v52 = vpop.permute.xlu0 %843  ;;  %v530_v47 = vadd.f32 %v505_v23, %v376_v24 }
 0x16f   :  { %v881_v17 = vmul.f32 %v839_v7, %v706_v19  ;;  %v682_v58 = vadd.f32 %v657_v0, %v528_v56 }
 0x170   :  { %v622_v55 = vpop.permute.xlu1 %621 }
 0x171   :  { %v905_v1 = vadd.f32 %v904_v14, %v881_v17  ;;  %v707_v35 = vmax.f32 %v682_v58, 0.0  ;;  %v658_v29 = vmul.f32 %v1489_v30, %v622_v55 }
 0x172   :  { %v854_v57 = vpop.permute.xlu0 %853 }
 0x173   :  { %v882_v2 = vmul.f32 %v844_v52, %v707_v35  ;;  %v683_v51 = vadd.f32 %v658_v29, %v1557_v36 }
 0x174   :  { %v626_v38 = vpop.permute.xlu1 %625 }
 0x175   :  { %v906_v21 = vadd.f32 %v905_v1, %v882_v2  ;;  %v659_v41 = vmul.f32 %v1489_v30, %v626_v38  ;;  %v708_v44 = vmax.f32 %v683_v51, 0.0 }
 0x176   :  { %v920_v43 = vpop.permute.xlu0 %919 }
 0x177   :  { %v684_v63 = vadd.f32 %v659_v41, %v530_v47 }
 0x178   :  { %v630_v48 = vpop.permute.xlu1 %629 }
 0x179   :  { %v660_v5 = vmul.f32 %v1489_v30, %v630_v48  ;;  %v709_v59 = vmax.f32 %v684_v63, 0.0 }
 0x17b   :  { %v685_v4 = vadd.f32 %v660_v5, %v1563_v37  ;;  %v884_v9 = vmul.f32 %v854_v57, %v709_v59  ;;  %v925_v37 = vrot.slane %v920_v43, %v1679_v10 }
 0x17d   :  { %v849_v15 = vpop.permute.xlu1 %848  ;;  %v710_v12 = vmax.f32 %v685_v4, 0.0 }
 0x17e   :  { %v883_v40 = vmul.f32 %v849_v15, %v708_v44 }
 0x180   :  { %v907_v60 = vadd.f32 %v906_v21, %v883_v40 }
 0x181   :  { %v859_v28 = vpop.permute.xlu1 %858 }
 0x182   :  { %v885_v6 = vmul.f32 %v859_v28, %v710_v12  ;;  %v908_v31 = vadd.f32 %v907_v60, %v884_v9 }
 0x184   :  { %v909_v3 = vadd.f32 %v908_v31, %v885_v6 }
 0x186   :  { %v910_v50 = vrot.slane %v909_v3, 4 }
 0x188   :  { %v911_v36 = vadd.f32 %v910_v50, %v909_v3 }
 0x18a   :  { %v912_v49 = vrot.slane %v911_v36, 2 }
 0x18c   :  { %v913_v61 = vadd.f32 %v912_v49, %v911_v36 }
 0x18e   :  { %v914_v30 = vrot.slane %v913_v61, 1 }
 0x190   :  { %v915_v8 = vadd.f32 %v914_v30, %v913_v61 }
 0x192   :  { %v926_v18 = vadd.f32 %v925_v37, %v915_v8 }
 0x194   :  { %v948_v53 = vmul.f32 -1.442695, %v926_v18 }
 0x196   :  { %962 = vpow2.f32 %v948_v53 }
 0x1a3   :  { %v963_v45 = vpop.eup %962 }
 0x1a4   :  { %v930_v54 = vadd.f32 1.0, %v963_v45 }
 0x1a6   :  { %964 = vrcp.f32 %v930_v54 }
 0x1b3   :  { %v965_v26 = vpop.eup %964 }
 0x1b4   :  { %933 = vst [vmem:[#allocation3] sm:$0x1] %v965_v26 }
 0x1b5   :  { %977 = shalt.err (!%p974_p4)
}
 0x1b6   :  { %943 = dma.vmem_to_hbm [thread:$0]  %s941_s10, 16, %s1666_s5, [#allocation4]  }
 0x1b7   :  { %986 = dma.done.wait [#allocation4], 16  }
 0x1b8   :  { %987 = vsyncadd [#allocation4], 4294967280 }
 0x1b9   :  { %947 = vsyncpa [#allocation4], 1 }

</bundles_post_ra>
